<compile_context>
chip_gen: v7x
topology: tpu7x:2x2x1
jax: 0.10.0
libtpu: 0.0.40
codegen_flags: <defaults>
</compile_context>

<pallas_src>
import math

import jax
import jax.numpy as jnp
import numpy as np
from jax.experimental import pallas as pl
from jax.experimental.pallas import tpu as pltpu


def _outconv_kernel(x_ref, w_ref, b_ref, o_ref):
    # x_ref: (TB, C_in, T)   input tile (T lanes of pixels, TB images)
    # w_ref: (C_out, C_in)   1x1-conv weight (resident across the grid)
    # b_ref: (C_out, 1)      bias (broadcast over lanes)
    # o_ref: (TB, C_out, T)  output tile
    y = jnp.einsum("oc,bct->bot", w_ref[...], x_ref[...],
                   preferred_element_type=jnp.float32)
    o_ref[...] = (y + b_ref[...][None]).astype(o_ref.dtype)


def _vmem_limit_bytes():
    """Per-generation scoped-VMEM target (~3/4 of per-core VMEM, <= 96 MiB)."""
    cap = None
    try:
        cap = getattr(pltpu.get_tpu_info(), "vmem_capacity_bytes", None)
    except Exception:
        cap = None
    if not cap:
        cap = 64 << 20  # conservative default (v7x per-TensorCore VMEM)
    return int(min(cap * 3 // 4, 96 << 20))  # 48 MiB on v7x, 96 MiB on v5e/v6e


def _plan_tiles(N, C_in, C_out, HWp, dtype_bytes, vmem_limit):
    """Pick (tile_b, tile_hw) from a VMEM byte budget.

    Budget covers the double-buffered input + output blocks; weight/bias are
    tiny and live inside the 20% headroom left on the scoped limit.
    """
    block_budget = int(vmem_limit * 0.8)
    per_lane = 2 * (C_in + C_out) * dtype_bytes  # dbl-buffered in+out per lane

    tile_hw = max(128, (block_budget // per_lane) // 128 * 128)
    tile_hw = min(tile_hw, HWp)

    # If one tile covers a whole image, block several batch entries per step.
    tile_b = 1
    if tile_hw >= HWp:
        tile_hw = HWp
        tile_b = max(1, min(N, block_budget // (per_lane * HWp)))

    # Keep >= 2 grid iterations when possible so both v7x TensorCores get work.
    def steps(tb, t):
        return math.ceil(N / tb) * math.ceil(HWp / t)

    while steps(tile_b, tile_hw) < 2:
        if tile_b > 1:
            tile_b = (tile_b + 1) // 2
        elif tile_hw > 128:
            tile_hw = max(128, (tile_hw // 2) // 128 * 128)
        else:
            break
    return tile_b, tile_hw


def out_conv(x_nchw, conv_w, conv_b):
    """x_nchw: (N, C_in, H, W); conv_w: (C_out, C_in, 1, 1); conv_b: (C_out,)."""
    N, C_in, H, W = x_nchw.shape
    C_out = conv_w.shape[0]
    HW = H * W
    dtype_bytes = jnp.dtype(x_nchw.dtype).itemsize

    x3 = x_nchw.reshape(N, C_in, HW)  # layout-only reshape (contiguous dims)
    # Pad the lane axis to a multiple of 128 only when it is not one already.
    HWp = ((HW + 127) // 128) * 128
    if HWp != HW:
        x3 = jnp.pad(x3, ((0, 0), (0, 0), (0, HWp - HW)))

    # Keep the streamed dtype (bf16 stays bf16); bias add stays f32 in-kernel.
    w2 = conv_w.reshape(C_out, C_in).astype(x_nchw.dtype)
    b2 = conv_b.reshape(C_out, 1).astype(jnp.float32)

    vmem_limit = _vmem_limit_bytes()
    tile_b, tile_hw = _plan_tiles(N, C_in, C_out, HWp, dtype_bytes, vmem_limit)
    grid = (pl.cdiv(N, tile_b), pl.cdiv(HWp, tile_hw))

    cost = pl.CostEstimate(
        flops=2 * N * HW * C_in * C_out,
        bytes_accessed=dtype_bytes * N * HW * (C_in + C_out)
        + dtype_bytes * C_out * C_in + 4 * C_out,
        transcendentals=0,
    )

    out3 = pl.pallas_call(
        _outconv_kernel,
        out_shape=jax.ShapeDtypeStruct((N, C_out, HWp), x_nchw.dtype),
        grid_spec=pl.GridSpec(
            grid=grid,
            in_specs=[
                pl.BlockSpec((tile_b, C_in, tile_hw), lambda nb, j: (nb, 0, j)),
                pl.BlockSpec((C_out, C_in), lambda nb, j: (0, 0)),
                pl.BlockSpec((C_out, 1), lambda nb, j: (0, 0)),
            ],
            out_specs=pl.BlockSpec((tile_b, C_out, tile_hw),
                                   lambda nb, j: (nb, 0, j)),
        ),
        compiler_params=pltpu.CompilerParams(
            dimension_semantics=("parallel", "parallel"),
            vmem_limit_bytes=vmem_limit,
        ),
        cost_estimate=cost,
    )(x3, w2, b2)

    if HWp != HW:
        out3 = out3[:, :, :HW]
    return out3.reshape(N, C_out, H, W)


def _reference(x, conv_w, conv_b):
    w2 = conv_w.reshape(conv_w.shape[0], conv_w.shape[1])
    return jnp.einsum("oc,nchw->nohw", w2, x) + conv_b[None, :, None, None]


if __name__ == "__main__":
    key = jax.random.PRNGKey(0)
    k_x, k_w, k_b = jax.random.split(key, 3)

    N, C_in, C_out, H, W = 2, 4, 4, 16, 16
    x = jax.random.normal(k_x, (N, C_in, H, W), dtype=jnp.float32)

    # PyTorch-style Conv2d init: uniform(-1/sqrt(fan_in), 1/sqrt(fan_in)).
    fan_in = C_in  # 1x1 kernel
    bound = 1.0 / np.sqrt(fan_in)
    conv_w = jax.random.uniform(k_w, (C_out, C_in, 1, 1), jnp.float32, -bound, bound)
    conv_b = jax.random.uniform(k_b, (C_out,), jnp.float32, -bound, bound)

    out = out_conv(x, conv_w, conv_b)
    out = jax.block_until_ready(out)

    ref = _reference(x, conv_w, conv_b)
    np.testing.assert_allclose(np.asarray(out), np.asarray(ref), rtol=1e-5, atol=1e-5)

    print("KERNEL_OK")
</pallas_src>

<mosaic_0001>
module attributes {stable_mosaic.version = 11 : i64} {
  func.func @_outconv_kernel(%arg0: i32, %arg1: i32, %arg2: memref<1x4x256xf32, #tpu.memory_space<vmem>>, %arg3: memref<4x4xf32, #tpu.memory_space<vmem>>, %arg4: memref<4x1xf32, #tpu.memory_space<vmem>>, %arg5: memref<1x4x256xf32, #tpu.memory_space<vmem>>) attributes {dimension_semantics = [#tpu.dimension_semantics<parallel>, #tpu.dimension_semantics<parallel>], iteration_bounds = array<i64: 2, 1>, scalar_prefetch = 0 : i64, scratch_operands = 0 : i64, tpu.core_type = #tpu.core_type<tc>, window_params = [{transform_indices = @transform_0, window_bounds = array<i64: 1, 4, 256>}, {pipeline_mode = #tpu.pipeline_mode<synchronous>, transform_indices = @transform_1, window_bounds = array<i64: 4, 4>}, {pipeline_mode = #tpu.pipeline_mode<synchronous>, transform_indices = @transform_2, window_bounds = array<i64: 4, 1>}, {transform_indices = @transform_3, window_bounds = array<i64: 1, 4, 256>}]} {
    %c0 = arith.constant 0 : index
    %c0_0 = arith.constant 0 : index
    %0 = vector.load %arg3[%c0, %c0_0] : memref<4x4xf32, #tpu.memory_space<vmem>>, vector<4x4xf32>
    %c0_1 = arith.constant 0 : index
    %c0_2 = arith.constant 0 : index
    %c0_3 = arith.constant 0 : index
    %1 = vector.load %arg2[%c0_1, %c0_2, %c0_3] : memref<1x4x256xf32, #tpu.memory_space<vmem>>, vector<1x4x256xf32>
    "tpu.trace_start"() <{level = 10 : i32, message = "oc,bct->bot"}> : () -> ()
    %cst = arith.constant dense<0.000000e+00> : vector<1x256x4xf32>
    %2 = tpu.matmul %1, %0, %cst {dimension_numbers = #tpu.dot_dimension_numbers<[1], [1], [0, 2], [0], [0, 0, 0, 2, 1, 0], [], []>} : vector<1x4x256xf32>, vector<4x4xf32>, vector<1x256x4xf32> -> vector<1x256x4xf32>
    %3 = tpu.transpose %2, [0, 2, 1] : vector<1x256x4xf32> -> vector<1x4x256xf32>
    "tpu.trace_stop"() : () -> ()
    %c0_4 = arith.constant 0 : index
    %c0_5 = arith.constant 0 : index
    %4 = vector.load %arg4[%c0_4, %c0_5] : memref<4x1xf32, #tpu.memory_space<vmem>>, vector<4x1xf32>
    %5 = vector.shape_cast %4 : vector<4x1xf32> to vector<1x4x1xf32>
    %6 = vector.broadcast %5 : vector<1x4x1xf32> to vector<1x4x256xf32>
    %7 = arith.addf %3, %6 : vector<1x4x256xf32>
    %c0_6 = arith.constant 0 : index
    %c0_7 = arith.constant 0 : index
    %c0_8 = arith.constant 0 : index
    %8 = vector.load %arg5[%c0_6, %c0_7, %c0_8] : memref<1x4x256xf32, #tpu.memory_space<vmem>>, vector<1x4x256xf32>
    tpu.vector_store %arg5[%c0_6, %c0_7, %c0_8], %7 {strides = array<i32>} : memref<1x4x256xf32, #tpu.memory_space<vmem>>, vector<1x4x256xf32>,
    return
  }
  func.func @transform_0(%arg0: i32, %arg1: i32) -> (i32, i32, i32) {
    %c0_i32 = arith.constant 0 : i32
    %c0_i32_0 = arith.constant 0 : i32
    return %arg0, %c0_i32, %arg1 : i32, i32, i32
  }
  func.func @transform_1(%arg0: i32, %arg1: i32) -> (i32, i32) {
    %c0_i32 = arith.constant 0 : i32
    %c0_i32_0 = arith.constant 0 : i32
    %c0_i32_1 = arith.constant 0 : i32
    return %c0_i32, %c0_i32_0 : i32, i32
  }
  func.func @transform_2(%arg0: i32, %arg1: i32) -> (i32, i32) {
    %c0_i32 = arith.constant 0 : i32
    %c0_i32_0 = arith.constant 0 : i32
    %c0_i32_1 = arith.constant 0 : i32
    return %c0_i32, %c0_i32_0 : i32, i32
  }
  func.func @transform_3(%arg0: i32, %arg1: i32) -> (i32, i32, i32) {
    %c0_i32 = arith.constant 0 : i32
    %c0_i32_0 = arith.constant 0 : i32
    return %arg0, %c0_i32, %arg1 : i32, i32, i32
  }
}

</mosaic_0001>

<bundles_post_ra>
// kernel: tpu_custom_call.1
= control target key start
LH: loop header
LB: loop body
LE: loop exit
PB: predicated region body
PF: predicated region fallthrough
CT: control target
= control target key end

     0   :  { %8 = vsyncpa [#allocation3], 0  ;;  %s1336_s0 = inlined_call_operand.hbm [shape: f32[2,4,256], index: 0, kind: input, shape index: {}]   ;;  %s1337_s1 = inlined_call_operand.vmem [shape: f32[4,4], index: 1, kind: input, shape index: {}]   ;;  %s1338_s2 = inlined_call_operand.vmem [shape: f32[4,1], index: 2, kind: input, shape index: {}]   ;;  %s1339_s3 = inlined_call_operand.hbm [shape: f32[2,4,256], index: 3, kind: output, shape index: {}]  }
   0x1   :  { %10 = vsyncpa [#allocation3 + $0x1], 0 }
   0x2   :  { %11 = vsyncpa [#allocation4], 0 }
   0x3   :  { %13 = vsyncpa [#allocation4 + $0x1], 0  ;;  %s1118_s12 = smov 0   ;;  %s1120_s13 = smov 0  }
   0x4   :  { %s1122_s14 = smov 0   ;;  %s1124_s15 = smov 0  }
   0x5   :  { %s1126_s16 = smov 0   ;;  %s1128_s17 = smov 0  }
   0x6 LB: > { %s779_s18 = sadd.s32 4294967295, %s1093_s17   ;;  %s780_s19 = sadd.s32 4294967294, %s1093_s17   ;;  %s1093_s17 = sphi %s1128_s17, %s19_s17   ;;  %s1089_s16 = sphi %s1126_s16, %s1355_s16   ;;  %s1085_s15 = sphi %s1124_s15, %s1354_s15   ;;  %s1081_s14 = sphi %s1122_s14, %s1353_s14   ;;  %s1077_s13 = sphi %s1120_s13, %s1352_s13   ;;  %s1073_s12 = sphi %s1118_s12, %s1351_s12  }
   0x7   : > { %s31_s20 = sadd.s32 1, %s1089_s16  ;;  %s40_s21 = sadd.s32 1, %s1081_s14 }
   0x8   : > { %p33_p0 = scmp.ge.s32.totalorder %s31_s20, 2  ;;  %p47_p1 = scmp.ne.s32.totalorder %s1081_s14, %s1077_s13 }
   0x9   : > { %p48_p2 = scmp.eq.s32.totalorder %s1093_s17, 0  ;;  %p53_p3 = scmp.ne.s32.totalorder %s1077_s13, %s1073_s12 }
   0xa   : > { %s1357_s20 = smov (%p33_p0, %s31_s20), 0  ;;  %p54_p5 = scmp.eq.s32.totalorder %s779_s18, 0 }
   0xb   : > { %p1159_p4 = por %p48_p2, %p47_p1  ;;  %s35_s23 = ssub.s32 %s1089_s16, %s1357_s20 }
   0xc   : > { %p121_p6 = scmp.eq.s32.totalorder %s779_s18, 1  ;;  %p38_p7 = scmp.eq.s32.totalorder %s35_s23, 0 }
   0xd   : > { %p1165_p8 = por %p54_p5, %p53_p3  ;;  %p127_p10 = scmp.eq.s32.totalorder %s780_s19, 1 }
   0xe   : > { %p1169_p9 = por %p121_p6, %p47_p1  ;;  %p926_p13 = scmp.lt.s32.totalorder %s1093_s17, 2 }
   0xf   : > { %s1174_s26 = scalar_select %p38_p7, %s1081_s14, %s40_s21  }
  0x10   : > { %s1343_s25 = scalar_select %p1169_p9, 1, 0 }
  0x11   : > { %p1176_p11 = por %p127_p10, %p53_p3  ;;  %s153_s28 = sand.u32 1, %s1081_s14  }
  0x12   : > { %s783_s29 = sshll.u32 %s153_s28, 3  ;;  %s827_s30 = sshll.u32 %s1089_s16, 7 }
  0x13   : > { %s1344_s27 = scalar_select %p1176_p11, 1, 0 }
  0x14   : > { %s1187_s6 = scalar_lea.hbm %s1336_s0, %s827_s30  ;;  %s157_s7 = scalar_lea.vmem [#allocation2], %s783_s29 }
  0x15   : > { %s167_s8 = sshll.u32 %s157_s7, 4  ;;  %p1193_p0 = pnand %p926_p13, %p1159_p4  ;;  %s1189_s8 = int_to_ptr.vmem [resolvable:$true] %s167_s8 }
  0x16   : > { %s154_s10 = scalar_lea.sflag [#allocation3], %s153_s28  ;;  %s981_s11 = scalar_lea.hbm %s1187_s6, 128 }
  0x17   : > { %p982_p3 = scmp.ne.s32.totalorder %s1187_s6, %s981_s11  ;;  %p983_p5 = pneg %p1193_p0 }
  0x18   : > { %s986_s21 = scalar_lea.hbm %s1336_s0, 256  ;;  %p987_p4 = scmp.lt.u32.totalorder %s1187_s6, %s1336_s0 }
  0x19   : > { %p984_p6 = pnand %p983_p5, %p982_p3  ;;  %p988_p10 = scmp.lt.u32.totalorder %s986_s21, %s981_s11 }
  0x1a   : > { %p990_p12 = scmp.lt.u32.totalorder %s981_s11, %s1187_s6 }
  0x1b   : > { %p985_p7 = pneg %p984_p6  ;;  %p989_p13 = por %p988_p10, %p987_p4 }
  0x1d   : > { %p991_p1 = por %p990_p12, %p989_p13 }
  0x1f   : > { %p992_p2 = pnand %p991_p1, %p985_p7 }
  0x21   : > { %995 = shalt.err (!%p992_p2)
}
  0x22   : > { %s996_s28 = scalar_lea.vmem %s1189_s8, 128  ;;  %s1095_s29 = smov [#allocation2]  }
  0x23   : > { %p997_p3 = scmp.ne.s32.totalorder %s1189_s8, %s996_s28  ;;  %s1001_s30 = sshll.u32 %s1095_s29, 4  ;;  %s1002_s30 = int_to_ptr.vmem [resolvable:$false] %s1001_s30 }
  0x24   : > { %s1003_s4 = scalar_lea.vmem %s1002_s30, 256  ;;  %p1004_p9 = scmp.lt.s32.totalorder %s1189_s8, %s1002_s30 }
  0x25   : > { %p999_p6 = pnand %p997_p3, %p983_p5  ;;  %p1005_p4 = scmp.lt.s32.totalorder %s1003_s4, %s996_s28 }
  0x27   : > { %p1000_p11 = pneg %p999_p6  ;;  %p1006_p10 = por %p1005_p4, %p1004_p9 }
  0x29   : > { %p1007_p12 = pnand %p1006_p10, %p1000_p11 }
  0x2b   : > { %1010 = shalt.err (!%p1007_p12)
}
  0x2c   : > { %921 = dma.hbm_to_vmem [thread:$0]  (!%p1193_p0), %s1187_s6, 128, %s1189_s8, %s154_s10  }
  0x2d   : > { %p1346_p1 = scmp.lt.s32.totalorder %s1093_s17, 3  ;;  %p1347_p2 = scmp.ge.s32.totalorder %s1093_s17, 1 }
  0x2f   : > { %p173_p5 = pnand %p1347_p2, %p1346_p1 }
  0x30   : > { %s1229_s5 = sand.u32 (!%p173_p5), 1, %s1077_s13  }
  0x31   : > { %176 = sbr.rel (%p173_p5) target bundleno = 641 (0x281), region = 32  ;;  %s787_s7 = sshll.u32 (!%p173_p5), %s1229_s5, 3 }
  0x32   : > { %s179_s11 = scalar_lea.sflag (!%p173_p5), [#allocation3], %s1229_s5  ;;  %s182_s9 = scalar_lea.vmem (!%p173_p5), [#allocation2], %s787_s7 }
  0x38   : > { %1064 = dma.done.wait (%p1165_p8), %s179_s11, 128  }
  0x39   : > { %1066 = vsyncadd (%p1165_p8), %s179_s11, 4294967168  ;;  %v208_v0 = vld [vmem:[%s182_s9] sm:$0xff]  ;;  %vm276_vm0 = vcmask 31744   ;;  %v1096_v60 = vmov 0   ;;  %s828_s18 = sshll.u32 %s1085_s15, 7  ;;  %s204_s19 = scalar_lea.vmem [#allocation5], %s787_s7 }
  0x3a   : > { %212 = vxpose.xlu0.b32.start.end [1/1] (short) %v208_v0, 128  ;;  %v207_v1 = vld [vmem:[%s1337_s1] sm:$0xf]  ;;  %v210_v2 = vcombine.high %v208_v0, %v208_v0  ;;  %s695_s21 = sshll.u32 %s204_s19, 4  ;;  %s1287_s28 = scalar_lea.hbm %s1339_s3, %s828_s18  ;;  %s1289_s21 = int_to_ptr.vmem [resolvable:$true] %s695_s21 }
  0x3b   : > { %862 = vmatprep.subr.msk.mxu0 %vm276_vm0, %v207_v1  ;;  %912 = vmatprep.subr.msk.mxu1 %vm276_vm0, %v207_v1  ;;  %v665_v59 = vld [vmem:[%s1338_s2] sm:$0xf]  ;;  %s679_s29 = scalar_lea.sflag [#allocation4], %s1229_s5  ;;  %s1011_s30 = scalar_lea.vmem %s1289_s21, 128 }
  0x3c   : > { %863 = vmatpush3.xpose.msk.msra.mxu0 %vm276_vm0, %v207_v1  ;;  %913 = vmatpush3.xpose.msk.msra.mxu1 %vm276_vm0, %v207_v1  ;;  %p1012_p8 = scmp.ne.s32.totalorder %s1289_s21, %s1011_s30  ;;  %p1348_p9 = scmp.ne.s32.totalorder %s1343_s25, 0 }
  0x3d   : > { %s1097_s15 = smov [#allocation5]  }
  0x3e   : > { %p1013_p11 = pnand %p1012_p8, %p1348_p9  ;;  %s1015_s4 = sshll.u32 %s1097_s15, 4  ;;  %s1016_s4 = int_to_ptr.vmem [resolvable:$false] %s1015_s4 }
  0x3f   : > { %s1017_s7 = scalar_lea.vmem %s1016_s4, 256  ;;  %p1018_p7 = scmp.lt.s32.totalorder %s1289_s21, %s1016_s4 }
  0x40   : > { %p1014_p0 = pneg %p1013_p11  ;;  %p1019_p13 = scmp.lt.s32.totalorder %s1017_s7, %s1011_s30 }
  0x42   : > { %p1020_p3 = por %p1019_p13, %p1018_p7 }
  0x44   : > { %p1021_p6 = pnand %p1020_p3, %p1014_p0 }
  0x77   : > { %244 = vxpose.xlu0.b32.start.end [1/1] (short) %v210_v2, 128 }
  0xba   : > { %v228_v3 = vpop.trf.xlu0 }
  0xbb   : > { %864 = vmatprep.mubr.msk.f32.mxu0 %vm276_vm0, %v228_v3 }
  0xbe   : > { %v229_v4 = vpop.trf.xlu0 }
  0xbf   : > { %865 = vmatmul.mubr.msk.f32.vlgmr.msra.gmra.mrb[0].mxu0 %vm276_vm0, %v229_v4 }
  0xc2   : > { %v230_v5 = vpop.trf.xlu0 }
  0xc3   : > { %867 = vmatprep.mubr.msk.f32.mxu0 %vm276_vm0, %v230_v5 }
  0xc6   : > { %v231_v6 = vpop.trf.xlu0 }
  0xc7   : > { %868 = vmatmul.mubr.msk.f32.gmra.mrb[2].mxu0 %vm276_vm0, %v231_v6 }
  0xca   : > { %v232_v7 = vpop.trf.xlu0 }
  0xcb   : > { %870 = vmatprep.mubr.msk.f32.mxu0 %vm276_vm0, %v232_v7 }
  0xce   : > { %v233_v8 = vpop.trf.xlu0 }
  0xcf   : > { %871 = vmatmul.mubr.msk.f32.gmra.mrb[4].mxu0 %vm276_vm0, %v233_v8 }
  0xd2   : > { %v234_v9 = vpop.trf.xlu0 }
  0xd3   : > { %873 = vmatprep.mubr.msk.f32.mxu0 %vm276_vm0, %v234_v9 }
  0xd6   : > { %v235_v10 = vpop.trf.xlu0 }
  0xd7   : > { %874 = vmatmul.mubr.msk.f32.gmra.mrb[6].mxu0 %vm276_vm0, %v235_v10 }
  0xda   : > { %v236_v11 = vpop.trf.xlu0 }
  0xdb   : > { %876 = vmatprep.mubr.msk.f32.mxu0 %vm276_vm0, %v236_v11 }
  0xde   : > { %v237_v12 = vpop.trf.xlu0 }
  0xdf   : > { %877 = vmatmul.mubr.msk.f32.gmra.mrb[8].mxu0 %vm276_vm0, %v237_v12 }
  0xe2   : > { %v238_v13 = vpop.trf.xlu0 }
  0xe3   : > { %879 = vmatprep.mubr.msk.f32.mxu0 %vm276_vm0, %v238_v13 }
  0xe6   : > { %v239_v14 = vpop.trf.xlu0 }
  0xe7   : > { %880 = vmatmul.mubr.msk.f32.gmra.mrb[10].mxu0 %vm276_vm0, %v239_v14 }
  0xea   : > { %v240_v15 = vpop.trf.xlu0 }
  0xeb   : > { %882 = vmatprep.mubr.msk.f32.mxu0 %vm276_vm0, %v240_v15 }
  0xee   : > { %v241_v16 = vpop.trf.xlu0 }
  0xef   : > { %883 = vmatmul.mubr.msk.f32.gmra.mrb[12].mxu0 %vm276_vm0, %v241_v16 }
  0xf2   : > { %v242_v17 = vpop.trf.xlu0 }
  0xf3   : > { %885 = vmatprep.mubr.msk.f32.mxu0 %vm276_vm0, %v242_v17 }
  0xf6   : > { %v243_v18 = vpop.trf.xlu0 }
  0xf7   : > { %886 = vmatmul.mubr.msk.f32.gmra.mrb[14].mxu0 %vm276_vm0, %v243_v18 }
  0xfa   : > { %v260_v19 = vpop.trf.xlu0 }
  0xfb   : > { %888 = vmatprep.mubr.msk.f32.mxu1 %vm276_vm0, %v260_v19 }
  0xfe   : > { %v261_v20 = vpop.trf.xlu0 }
  0xff   : > { %889 = vmatmul.mubr.msk.f32.vlgmr.msra.gmra.mrb[0].mxu1 %vm276_vm0, %v261_v20 }
 0x102   : > { %v262_v21 = vpop.trf.xlu0 }
 0x103   : > { %891 = vmatprep.mubr.msk.f32.mxu1 %vm276_vm0, %v262_v21 }
 0x106   : > { %v263_v22 = vpop.trf.xlu0 }
 0x107   : > { %892 = vmatmul.mubr.msk.f32.gmra.mrb[2].mxu1 %vm276_vm0, %v263_v22 }
 0x10a   : > { %v264_v23 = vpop.trf.xlu0 }
 0x10b   : > { %894 = vmatprep.mubr.msk.f32.mxu1 %vm276_vm0, %v264_v23 }
 0x10e   : > { %v265_v24 = vpop.trf.xlu0 }
 0x10f   : > { %895 = vmatmul.mubr.msk.f32.gmra.mrb[4].mxu1 %vm276_vm0, %v265_v24 }
 0x112   : > { %v266_v25 = vpop.trf.xlu0 }
 0x113   : > { %897 = vmatprep.mubr.msk.f32.mxu1 %vm276_vm0, %v266_v25 }
 0x116   : > { %v267_v26 = vpop.trf.xlu0 }
 0x117   : > { %898 = vmatmul.mubr.msk.f32.gmra.mrb[6].mxu1 %vm276_vm0, %v267_v26 }
 0x11a   : > { %v268_v27 = vpop.trf.xlu0 }
 0x11b   : > { %900 = vmatprep.mubr.msk.f32.mxu1 %vm276_vm0, %v268_v27 }
 0x11e   : > { %v269_v28 = vpop.trf.xlu0 }
 0x11f   : > { %901 = vmatmul.mubr.msk.f32.gmra.mrb[8].mxu1 %vm276_vm0, %v269_v28 }
 0x122   : > { %v270_v29 = vpop.trf.xlu0 }
 0x123   : > { %903 = vmatprep.mubr.msk.f32.mxu1 %vm276_vm0, %v270_v29 }
 0x126   : > { %v271_v30 = vpop.trf.xlu0 }
 0x127   : > { %904 = vmatmul.mubr.msk.f32.gmra.mrb[10].mxu1 %vm276_vm0, %v271_v30 }
 0x12a   : > { %v272_v31 = vpop.trf.xlu0 }
 0x12b   : > { %906 = vmatprep.mubr.msk.f32.mxu1 %vm276_vm0, %v272_v31 }
 0x12e   : > { %v273_v32 = vpop.trf.xlu0 }
 0x12f   : > { %907 = vmatmul.mubr.msk.f32.gmra.mrb[12].mxu1 %vm276_vm0, %v273_v32 }
 0x132   : > { %v274_v33 = vpop.trf.xlu0 }
 0x133   : > { %909 = vmatprep.mubr.msk.f32.mxu1 %vm276_vm0, %v274_v33 }
 0x136   : > { %v275_v34 = vpop.trf.xlu0 }
 0x137   : > { %910 = vmatmul.mubr.msk.f32.gmra.mrb[14].mxu1 %vm276_vm0, %v275_v34 }
 0x192   : > { %v866_v35 = vpop.f32.mrb[0].mxu0 }
 0x193   : > { %v442_v36 = vpop.f32.mrb[1].mxu0 }
 0x194   : > { %601 = vxpose.xlu1.b32.start [1/16] (narrow) %v442_v36, 8 }
 0x198   : > { %602 = vxpose.xlu1.b32.cont [2/16] (narrow) %v866_v35, 8 }
 0x19a   : > { %v869_v37 = vpop.f32.mrb[2].mxu0 }
 0x19b   : > { %v452_v38 = vpop.f32.mrb[3].mxu0 }
 0x19c   : > { %603 = vxpose.xlu1.b32.cont [3/16] (narrow) %v452_v38, 8 }
 0x1a0   : > { %604 = vxpose.xlu1.b32.cont [4/16] (narrow) %v869_v37, 8 }
 0x1a2   : > { %v872_v39 = vpop.f32.mrb[4].mxu0 }
 0x1a3   : > { %v462_v40 = vpop.f32.mrb[5].mxu0 }
 0x1a4   : > { %605 = vxpose.xlu1.b32.cont [5/16] (narrow) %v462_v40, 8 }
 0x1a8   : > { %606 = vxpose.xlu1.b32.cont [6/16] (narrow) %v872_v39, 8 }
 0x1aa   : > { %v875_v41 = vpop.f32.mrb[6].mxu0 }
 0x1ab   : > { %v472_v42 = vpop.f32.mrb[7].mxu0 }
 0x1ac   : > { %607 = vxpose.xlu1.b32.cont [7/16] (narrow) %v472_v42, 8 }
 0x1b0   : > { %608 = vxpose.xlu1.b32.cont [8/16] (narrow) %v875_v41, 8 }
 0x1b2   : > { %v878_v43 = vpop.f32.mrb[8].mxu0 }
 0x1b3   : > { %v482_v44 = vpop.f32.mrb[9].mxu0 }
 0x1b4   : > { %609 = vxpose.xlu1.b32.cont [9/16] (narrow) %v482_v44, 8 }
 0x1b8   : > { %610 = vxpose.xlu1.b32.cont [10/16] (narrow) %v878_v43, 8 }
 0x1ba   : > { %v881_v45 = vpop.f32.mrb[10].mxu0 }
 0x1bb   : > { %v492_v46 = vpop.f32.mrb[11].mxu0 }
 0x1bc   : > { %611 = vxpose.xlu1.b32.cont [11/16] (narrow) %v492_v46, 8 }
 0x1c0   : > { %612 = vxpose.xlu1.b32.cont [12/16] (narrow) %v881_v45, 8 }
 0x1c2   : > { %v884_v47 = vpop.f32.mrb[12].mxu0 }
 0x1c3   : > { %v502_v48 = vpop.f32.mrb[13].mxu0 }
 0x1c4   : > { %613 = vxpose.xlu1.b32.cont [13/16] (narrow) %v502_v48, 8 }
 0x1c8   : > { %614 = vxpose.xlu1.b32.cont [14/16] (narrow) %v884_v47, 8 }
 0x1ca   : > { %v887_v49 = vpop.f32.mrb[14].mxu0 }
 0x1cb   : > { %v512_v50 = vpop.f32.mrb[15].mxu0 }
 0x1cc   : > { %615 = vxpose.xlu1.b32.cont [15/16] (narrow) %v512_v50, 8 }
 0x1d0   : > { %616 = vxpose.xlu1.b32.end [16/16] (narrow) %v887_v49, 8 }
 0x1d2   : > { %v890_v51 = vpop.f32.mrb[0].mxu1 }
 0x1d3   : > { %v522_v52 = vpop.f32.mrb[1].mxu1 }
 0x1d4   : > { %633 = vxpose.xlu0.b32.start [1/16] (narrow) %v522_v52, 8 }
 0x1d8   : > { %634 = vxpose.xlu0.b32.cont [2/16] (narrow) %v890_v51, 8 }
 0x1da   : > { %v893_v53 = vpop.f32.mrb[2].mxu1 }
 0x1db   : > { %v532_v54 = vpop.f32.mrb[3].mxu1 }
 0x1dc   : > { %635 = vxpose.xlu0.b32.cont [3/16] (narrow) %v532_v54, 8 }
 0x1e0   : > { %636 = vxpose.xlu0.b32.cont [4/16] (narrow) %v893_v53, 8 }
 0x1e2   : > { %v896_v55 = vpop.f32.mrb[4].mxu1 }
 0x1e3   : > { %v542_v56 = vpop.f32.mrb[5].mxu1 }
 0x1e4   : > { %637 = vxpose.xlu0.b32.cont [5/16] (narrow) %v542_v56, 8 }
 0x1e8   : > { %638 = vxpose.xlu0.b32.cont [6/16] (narrow) %v896_v55, 8 }
 0x1ea   : > { %v899_v57 = vpop.f32.mrb[6].mxu1 }
 0x1eb   : > { %v552_v58 = vpop.f32.mrb[7].mxu1 }
 0x1ec   : > { %639 = vxpose.xlu0.b32.cont [7/16] (narrow) %v552_v58, 8 }
 0x1ee   : > { %978 = vset.pattern.permute.xlu1 %v1096_v60 }
 0x1ef   : > { %668 = vperm.xlu1 %978, %v665_v59  }
 0x1f0   : > { %640 = vxpose.xlu0.b32.cont [8/16] (narrow) %v899_v57, 8 }
 0x1f2   : > { %v902_v61 = vpop.f32.mrb[8].mxu1 }
 0x1f3   : > { %v562_v62 = vpop.f32.mrb[9].mxu1 }
 0x1f4   : > { %641 = vxpose.xlu0.b32.cont [9/16] (narrow) %v562_v62, 8 }
 0x1f8   : > { %642 = vxpose.xlu0.b32.cont [10/16] (narrow) %v902_v61, 8 }
 0x1fa   : > { %v905_v63 = vpop.f32.mrb[10].mxu1 }
 0x1fb   : > { %v572_v0 = vpop.f32.mrb[11].mxu1 }
 0x1fc   : > { %643 = vxpose.xlu0.b32.cont [11/16] (narrow) %v572_v0, 8 }
 0x200   : > { %644 = vxpose.xlu0.b32.cont [12/16] (narrow) %v905_v63, 8 }
 0x202   : > { %v908_v1 = vpop.f32.mrb[12].mxu1 }
 0x203   : > { %v582_v2 = vpop.f32.mrb[13].mxu1 }
 0x204   : > { %645 = vxpose.xlu0.b32.cont [13/16] (narrow) %v582_v2, 8 }
 0x208   : > { %646 = vxpose.xlu0.b32.cont [14/16] (narrow) %v908_v1, 8 }
 0x20a   : > { %v911_v3 = vpop.f32.mrb[14].mxu1 }
 0x20b   : > { %v592_v4 = vpop.f32.mrb[15].mxu1 }
 0x20c   : > { %647 = vxpose.xlu0.b32.cont [15/16] (narrow) %v592_v4, 8 }
 0x210   : > { %648 = vxpose.xlu0.b32.end [16/16] (narrow) %v911_v3, 8 }
 0x214   : > { %v617_v5 = vpop.trf.xlu1 }
 0x239   : > { %979 = vset.pattern.permute.xlu0 %v1096_v60 }
 0x254   : > { %v649_v6 = vpop.trf.xlu0 }
 0x26e   : > { %v669_v7 = vpop.permute.xlu1 %668 }
 0x26f   : > { %v671_v8 = vadd.f32 %v669_v7, %v617_v5  ;;  %v672_v9 = vadd.f32 %v669_v7, %v649_v6 }
 0x271   : > { %v675_v10 = vcombine.low %v671_v8, %v672_v9 }
 0x273   : > { %677 = vst [vmem:[%s204_s19] sm:$0xff] %v675_v10 }
 0x274   : > { %1024 = shalt.err (!%p1021_p6)
}
 0x275   : > { %s1025_s5 = scalar_lea.hbm %s1287_s28, 128  ;;  %s1029_s6 = scalar_lea.hbm %s1339_s3, 256 }
 0x276   : > { %p1026_p4 = scmp.ne.s32.totalorder %s1287_s28, %s1025_s5  ;;  %p1030_p1 = scmp.lt.u32.totalorder %s1287_s28, %s1339_s3 }
 0x277   : > { %p1031_p2 = scmp.lt.u32.totalorder %s1029_s6, %s1025_s5  ;;  %p1033_p8 = scmp.lt.u32.totalorder %s1025_s5, %s1287_s28 }
 0x278   : > { %p1027_p10 = pnand %p1026_p4, %p1348_p9 }
 0x279   : > { %p1032_p5 = por %p1031_p2, %p1030_p1 }
 0x27a   : > { %p1028_p12 = pneg %p1027_p10 }
 0x27b   : > { %p1034_p11 = por %p1033_p8, %p1032_p5 }
 0x27d   : > { %p1035_p0 = pnand %p1034_p11, %p1028_p12 }
 0x27f   : > { %1038 = shalt.err (!%p1035_p0)
}
 0x280   : > { %916 = dma.vmem_to_hbm [thread:$0]  (%p1348_p9), %s1289_s21, 128, %s1287_s28, %s679_s29  }
 0x281 PF: > { %s707_s10 = sand.u32 1, %s1073_s12   ;;  %p1349_p7 = scmp.ne.s32.totalorder %s1344_s27, 0 }
 0x282   : > { %p1350_p13 = scmp.ge.s32.totalorder %s1093_s17, 2  ;;  %s708_s18 = scalar_lea.sflag [#allocation4], %s707_s10 }
 0x284   : > { %p923_p3 = pnand %p1350_p13, %p1349_p7 }
 0x286   : > { %1068 = dma.done.wait (!%p923_p3), %s708_s18, 128  }
 0x287   : > { %1070 = vsyncadd (!%p923_p3), %s708_s18, 4294967168  ;;  %s19_s17 = sadd.s32 1, %s1093_s17   ;;  %s1351_s12 = smov %s1077_s13 }
 0x288   : > { %p16_p6 = scmp.ge.s32.totalorder %s19_s17, 4   ;;  %s1352_s13 = smov %s1081_s14 }
 0x289   : > { %s1353_s14 = smov %s1174_s26  ;;  %s1354_s15 = smov %s1089_s16 }
 0x28a   : > { %s1355_s16 = smov %s1357_s20  ;;  %18 = sbr.rel (!%p16_p6) target bundleno = 6 (0x6), region = 77 }
 0x291   :  { %713 = vsyncpa [#allocation3], 1 }
 0x292   :  { %715 = vsyncpa [#allocation3 + $0x1], 1 }
 0x293   :  { %716 = vsyncpa [#allocation4], 1 }
 0x294   :  { %718 = vsyncpa [#allocation4 + $0x1], 1 }

</bundles_post_ra>
